<compile_context>
chip_gen: v7x
topology: tpu7x:2x2x1
jax: 0.10.0
libtpu: 0.0.40
codegen_flags: <defaults>
</compile_context>

<pallas_src>
import jax
import jax.numpy as jnp
from jax.experimental import pallas as pl
from jax.experimental.pallas import tpu as pltpu


def _cblinear_kernel(w_ref, b_ref, x_ref, o_ref):
    # (C_out, C1) @ (C1, tw) on the MXU with f32 accumulation, fused bias add
    # broadcast over the lane axis, cast back to the output dtype.
    acc = jnp.dot(w_ref[...], x_ref[...], preferred_element_type=jnp.float32)
    o_ref[...] = (acc + b_ref[...]).astype(o_ref.dtype)


def cb_linear(x, weight, bias, c2s, *, tn=512):
    """CBLinear.forward: 1x1 conv (k=1, s=1, g=1, bias=True) + channel split.

    x:      (N, C1, H, W)
    weight: (C_out, C1, 1, 1) with C_out == sum(c2s)
    bias:   (C_out,)
    Returns a tuple of arrays (N, c2, H, W), one per entry of c2s.
    """
    N, C1, H, W = x.shape
    C_out = weight.shape[0]
    assert C_out == sum(c2s)
    assert weight.shape == (C_out, C1, 1, 1), weight.shape
    # TODO(synk): only the default CBLinear config (k=1, s=1, groups=1) is
    # lowered; general k>1 / strided / grouped conv paths are not implemented.

    w2 = weight.reshape(C_out, C1)
    b2 = bias.reshape(C_out, 1)

    # Free (contiguous) reshape: keep NCHW order, flatten spatial onto the
    # 128-lane axis. No transposes or padding copies in the wrapper.
    HW = H * W
    x3 = x.reshape(N, C1, HW)

    # Lane-axis tile width: a multiple of 128 lanes, or the full spatial
    # extent when it already fits in one block.
    tn = max(128, (int(tn) // 128) * 128)
    tw = HW if HW <= tn else tn
    grid = (N, pl.cdiv(HW, tw))

    out = pl.pallas_call(
        _cblinear_kernel,
        out_shape=jax.ShapeDtypeStruct((N, C_out, HW), x.dtype),
        grid=grid,
        in_specs=[
            pl.BlockSpec((C_out, C1), lambda n, i: (0, 0)),        # weight: resident
            pl.BlockSpec((C_out, 1), lambda n, i: (0, 0)),         # bias:   resident
            pl.BlockSpec((None, C1, tw), lambda n, i: (n, 0, i)),  # x: streamed, lane-dense
        ],
        out_specs=pl.BlockSpec((None, C_out, tw), lambda n, i: (n, 0, i)),
        compiler_params=pltpu.CompilerParams(
            dimension_semantics=("parallel", "parallel"),
        ),
    )(w2, b2, x3)

    # (N, C_out, HW) -> (N, C_out, H, W), free reshape.
    y = out.reshape(N, C_out, H, W)

    # Channel split into the per-branch chunks.
    outs = []
    idx = 0
    for c in c2s:
        outs.append(y[:, idx:idx + c])
        idx += c
    return tuple(outs)


if __name__ == "__main__":
    key = jax.random.PRNGKey(0)
    kx, kw, kb = jax.random.split(key, 3)

    # Small NCHW input consistent with CBLinear usage.
    N, C1, H, W = 2, 4, 16, 16
    c2s = (2, 3)
    C_out = sum(c2s)

    x = jax.random.normal(kx, (N, C1, H, W), dtype=jnp.float32)
    weight = jax.random.normal(kw, (C_out, C1, 1, 1), dtype=jnp.float32) * 0.1
    bias = jax.random.normal(kb, (C_out,), dtype=jnp.float32) * 0.1

    # Small tile so the test exercises a multi-step pipelined grid (2 x 2).
    outs = cb_linear(x, weight, bias, c2s, tn=128)
    outs = jax.block_until_ready(outs)

    # Pure-JAX reference: 1x1 conv + bias + channel split.
    y_ref = jnp.einsum("nchw,oc->nohw", x, weight.reshape(C_out, C1)) \
        + bias[None, :, None, None]
    idx = 0
    ok = True
    for out, c in zip(outs, c2s):
        ref_chunk = y_ref[:, idx:idx + c]
        idx += c
        assert out.shape == ref_chunk.shape, (out.shape, ref_chunk.shape)
        assert out.dtype == x.dtype, (out.dtype, x.dtype)
        ok &= bool(jnp.allclose(out, ref_chunk, rtol=1e-4, atol=1e-4))
    assert ok, "CBLinear Pallas kernel mismatch vs reference"

    print("KERNEL_OK")
</pallas_src>

<mosaic_0001>
module attributes {stable_mosaic.version = 11 : i64} {
  func.func @_cblinear_kernel(%arg0: i32, %arg1: i32, %arg2: memref<5x4xf32, #tpu.memory_space<vmem>>, %arg3: memref<5x1xf32, #tpu.memory_space<vmem>>, %arg4: memref<1x4x128xf32, #tpu.memory_space<vmem>>, %arg5: memref<1x5x128xf32, #tpu.memory_space<vmem>>) attributes {dimension_semantics = [#tpu.dimension_semantics<parallel>, #tpu.dimension_semantics<parallel>], iteration_bounds = array<i64: 2, 2>, scalar_prefetch = 0 : i64, scratch_operands = 0 : i64, tpu.core_type = #tpu.core_type<tc>, window_params = [{pipeline_mode = #tpu.pipeline_mode<synchronous>, transform_indices = @transform_0, window_bounds = array<i64: 5, 4>}, {pipeline_mode = #tpu.pipeline_mode<synchronous>, transform_indices = @transform_1, window_bounds = array<i64: 5, 1>}, {transform_indices = @transform_2, window_bounds = array<i64: 1, 4, 128>}, {transform_indices = @transform_3, window_bounds = array<i64: 1, 5, 128>}]} {
    %c0 = arith.constant 0 : index
    %c0_0 = arith.constant 0 : index
    %0 = vector.load %arg2[%c0, %c0_0] : memref<5x4xf32, #tpu.memory_space<vmem>>, vector<5x4xf32>
    %c0_1 = arith.constant 0 : index
    %c0_2 = arith.constant 0 : index
    %c0_3 = arith.constant 0 : index
    %1 = vector.load %arg4[%c0_1, %c0_2, %c0_3] : memref<1x4x128xf32, #tpu.memory_space<vmem>>, vector<1x4x128xf32>
    %2 = vector.shape_cast %1 : vector<1x4x128xf32> to vector<4x128xf32>
    %cst = arith.constant dense<0.000000e+00> : vector<5x128xf32>
    %3 = tpu.matmul %0, %2, %cst {dimension_numbers = #tpu.dot_dimension_numbers<[1], [0], [0], [1], [0, 0, 1, 1], [], []>} : vector<5x4xf32>, vector<4x128xf32>, vector<5x128xf32> -> vector<5x128xf32>
    %c0_4 = arith.constant 0 : index
    %c0_5 = arith.constant 0 : index
    %4 = vector.load %arg3[%c0_4, %c0_5] : memref<5x1xf32, #tpu.memory_space<vmem>>, vector<5x1xf32>
    %5 = vector.broadcast %4 : vector<5x1xf32> to vector<5x128xf32>
    %6 = arith.addf %3, %5 : vector<5x128xf32>
    %c0_6 = arith.constant 0 : index
    %c0_7 = arith.constant 0 : index
    %c0_8 = arith.constant 0 : index
    %7 = vector.load %arg5[%c0_6, %c0_7, %c0_8] : memref<1x5x128xf32, #tpu.memory_space<vmem>>, vector<1x5x128xf32>
    %8 = vector.shape_cast %7 : vector<1x5x128xf32> to vector<5x128xf32>
    %9 = vector.shape_cast %6 : vector<5x128xf32> to vector<1x5x128xf32>
    tpu.vector_store %arg5[%c0_6, %c0_7, %c0_8], %9 {strides = array<i32>} : memref<1x5x128xf32, #tpu.memory_space<vmem>>, vector<1x5x128xf32>,
    return
  }
  func.func @transform_0(%arg0: i32, %arg1: i32) -> (i32, i32) {
    %c0_i32 = arith.constant 0 : i32
    %c0_i32_0 = arith.constant 0 : i32
    %c0_i32_1 = arith.constant 0 : i32
    return %c0_i32, %c0_i32_0 : i32, i32
  }
  func.func @transform_1(%arg0: i32, %arg1: i32) -> (i32, i32) {
    %c0_i32 = arith.constant 0 : i32
    %c0_i32_0 = arith.constant 0 : i32
    %c0_i32_1 = arith.constant 0 : i32
    return %c0_i32, %c0_i32_0 : i32, i32
  }
  func.func @transform_2(%arg0: i32, %arg1: i32) -> (i32, i32, i32) {
    %c0_i32 = arith.constant 0 : i32
    %c0_i32_0 = arith.constant 0 : i32
    return %arg0, %c0_i32, %arg1 : i32, i32, i32
  }
  func.func @transform_3(%arg0: i32, %arg1: i32) -> (i32, i32, i32) {
    %c0_i32 = arith.constant 0 : i32
    %c0_i32_0 = arith.constant 0 : i32
    return %arg0, %c0_i32, %arg1 : i32, i32, i32
  }
}

</mosaic_0001>

<bundles_post_ra>
// kernel: tpu_custom_call.1
= control target key start
LH: loop header
LB: loop body
LE: loop exit
PB: predicated region body
PF: predicated region fallthrough
CT: control target
= control target key end

     0   :  { %s502_s12 = smov 0   ;;  %s504_s13 = smov 0   ;;  %s559_s0 = inlined_call_operand.vmem [shape: f32[5,4], index: 0, kind: input, shape index: {}]   ;;  %s560_s1 = inlined_call_operand.vmem [shape: f32[5,1], index: 1, kind: input, shape index: {}]   ;;  %s561_s2 = inlined_call_operand.vmem [shape: f32[2,4,256], index: 2, kind: input, shape index: {}]   ;;  %s562_s3 = inlined_call_operand.vmem [shape: f32[2,5,256], index: 3, kind: output, shape index: {}]  }
   0x1   :  { %s506_s14 = smov 0   ;;  %s508_s15 = smov 0  }
   0x2   :  { %s510_s16 = smov 0  }
   0x3 LB: > { %s22_s17 = sadd.s32 1, %s469_s14  ;;  %s25_s18 = sadd.s32 1, %s473_s15  ;;  %s477_s16 = sphi %s510_s16, %s13_s16   ;;  %s473_s15 = sphi %s508_s15, %s566_s15   ;;  %s469_s14 = sphi %s506_s14, %s565_s14   ;;  %s465_s13 = sphi %s504_s13, %s564_s13   ;;  %s461_s12 = sphi %s502_s12, %s563_s12  }
   0x4   : > { %p23_p0 = scmp.ge.s32.totalorder %s22_s17, 2  ;;  %p379_p1 = scmp.ge.s32.totalorder %s477_s16, 1 }
   0x5   : > { %p156_p2 = scmp.lt.s32.totalorder %s477_s16, 5 }
   0x6   : > { %s568_s17 = smov (%p23_p0, %s22_s17), 0  ;;  %s570_s18 = smov (!%p23_p0, %s25_s18), %s473_s15 }
   0x7   : > { %p157_p3 = pnand %p379_p1, %p156_p2  ;;  %p27_p4 = scmp.ge.s32.totalorder %s570_s18, 2 }
   0x8   : > { %p186_p5 = scmp.lt.s32.totalorder (!%p157_p3), %s465_s13, 1  ;;  %p188_p6 = scmp.lt.s32.totalorder (!%p157_p3), %s461_s12, 1  ;;  %v479_v0 = vmov (!%p157_p3), 0.0   ;;  %vm480_vm0 = vmmov (!%p157_p3), 0   ;;  %v204_v1 = vld [vmem:[%s560_s1] sm:$0x1f] (!%p157_p3) }
   0x9   : > { %s572_s18 = smov (%p27_p4, %s570_s18), 0  ;;  %160 = sbr.rel (%p157_p3) target bundleno = 238 (0xee), region = 32 }
   0xa   : > { %390 = vmatprep.subr.mxu0 (!%p157_p3), %v479_v0  ;;  %392 = vmatprep.mubr.msk.f32.mxu0 (!%p157_p3), %vm480_vm0, %v479_v0  ;;  %v481_v2 = vmov (!%p157_p3), 0   ;;  %vm214_vm1 = vcmask (!%p157_p3), 1043456   ;;  %v202_v3 = vld [vmem:[%s559_s0] sm:$0x1f] (!%p157_p3)  ;;  %vm210_vm2 = vcmask (!%p157_p3), 31744  }
   0xb   : > { %438 = vset.pattern.permute.xlu0 (!%p157_p3), %v481_v2 }
   0xc   : > { %207 = vperm.xlu0 (!%p157_p3), %438, %v204_v1  }
  0x10   : > { %s574_s13 = smov (!%p186_p5, %s465_s13), 1  ;;  %s576_s12 = smov (!%p188_p6, %s461_s12), 1 }
  0x11   : > { %s380_s21 = sshll.u32 %s574_s13, 1 }
  0x12   : > { %s191_s22 = sadd.s32 %s380_s21, %s576_s12 }
  0x13   : > { %s381_s23 = sshll.u32 %s191_s22, 2  ;;  %s383_s29 = sshll.u32 %s191_s22, 3 }
  0x14   : > { %s193_s26 = scalar_lea.vmem %s561_s2, %s381_s23  ;;  %s201_s5 = scalar_lea.vmem %s562_s3, %s383_s29 }
  0x15   : > { %v203_v4 = vld [vmem:[%s193_s26] sm:$0xf] }
  0x16   : > { %391 = vmatpush3.msk.msra.mxu0 %vm214_vm1, %v203_v4 }
  0x17   : > { %393 = vmatmul.mubr.msk.f32.vlgmr.msra.gmra.mrb[0].mxu0 %vm210_vm2, %v202_v3 }
  0x8b   : > { %v208_v5 = vpop.permute.xlu0 %207 }
  0xea   : > { %v284_v6 = vpop.f32.mrb[0].mxu0 }
  0xeb   : > { %v285_v7 = vadd.f32 %v284_v6, %v208_v5  ;;  %v394_v8 = vpop.f32.mrb[1].mxu0 }
  0xed   : > { %288 = vst [vmem:[%s201_s5] sm:$0x1f] %v285_v7 }
  0xee PF: > { %s13_s16 = sadd.s32 1, %s477_s16   ;;  %s563_s12 = smov %s469_s14 }
  0xef   : > { %p10_p7 = scmp.ge.s32.totalorder %s13_s16, 6   ;;  %s564_s13 = smov %s473_s15 }
  0xf0   : > { %s565_s14 = smov %s568_s17  ;;  %s566_s15 = smov %s572_s18 }
  0xf1   :  { %12 = sbr.rel (!%p10_p7) target bundleno = 3 (0x3), region = 62 }

</bundles_post_ra>
